<compile_context>
chip_gen: v7x
topology: tpu7x:2x2x1
jax: 0.10.0
libtpu: 0.0.40
codegen_flags: <defaults>
</compile_context>

<pallas_src>
import math
import functools

import jax
import jax.numpy as jnp
import numpy as np
from jax.experimental import pallas as pl
from jax.experimental.pallas import tpu as pltpu

_LANE = 128
_SUBLANE = 8


# ----------------------------------------------------------------------------
# Buffer setup (glue, plain JAX) — mirrors PositionalEncoding.__init__
# ----------------------------------------------------------------------------
def make_pe(d_model: int, max_len: int = 300) -> jnp.ndarray:
    pe = jnp.zeros((max_len, d_model), dtype=jnp.float32)
    position = jnp.arange(0, max_len, dtype=jnp.float32)[:, None]            # (max_len, 1)
    div_term = jnp.exp(
        jnp.arange(0, d_model, 2).astype(jnp.float32) * (-math.log(10000.0) / d_model)
    )
    pd = position * div_term                                                 # (max_len, ceil(D/2))
    pe = pe.at[:, 0::2].set(jnp.sin(pd))
    pe = pe.at[:, 1::2].set(jnp.cos(pd[:, 0:-1]))
    return pe[:, None, :]                                                    # (max_len, 1, D)


# ----------------------------------------------------------------------------
# Kernels (elementwise, memory-bound; lane-dense (rows, 128) blocks)
# ----------------------------------------------------------------------------
def _add_pe_kernel(x_ref, pe_ref, o_ref):
    o_ref[...] = x_ref[...] + pe_ref[...]


def _add_pe_dropout_kernel(x_ref, pe_ref, bits_ref, o_ref, *, inv_keep, thresh):
    y = x_ref[...] + pe_ref[...]
    # keep-test directly on raw uint32 bits against a precomputed integer
    # threshold: P(drop) = thresh / 2^24  (no int->float convert needed).
    keep = (bits_ref[...] & jnp.uint32(0x00FFFFFF)) >= jnp.uint32(thresh)
    o_ref[...] = jnp.where(
        keep, y * jnp.asarray(inv_keep, y.dtype), jnp.zeros((), y.dtype)
    ).astype(o_ref.dtype)


# ----------------------------------------------------------------------------
# Wrapper
# ----------------------------------------------------------------------------
@functools.partial(jax.jit, static_argnames=("p", "train", "block_rows"))
def positional_encoding_fwd(x, pe, key, *, p: float = 0.1, train: bool = True,
                            block_rows: int = 1024):
    S, B, D = x.shape
    dtype = x.dtype
    N = S * B * D

    # ---- lane-dense flat layout: (rows_padded, 128) ----
    rows = pl.cdiv(N, _LANE)
    br = min(block_rows, ((rows + _SUBLANE - 1) // _SUBLANE) * _SUBLANE)
    br = max(_SUBLANE, (br // _SUBLANE) * _SUBLANE)          # 8-row aligned tile
    rows_p = pl.cdiv(rows, br) * br                          # grid divides evenly
    pad = rows_p * _LANE - N

    x_flat = x.reshape(-1)
    # static slice of pe rows + broadcast over batch, flattened to match x.
    pe_flat = jnp.broadcast_to(pe[:S], (S, B, D)).astype(dtype).reshape(-1)
    if pad:
        x_flat = jnp.pad(x_flat, (0, pad))
        pe_flat = jnp.pad(pe_flat, (0, pad))
    x2 = x_flat.reshape(rows_p, _LANE)
    pe2 = pe_flat.reshape(rows_p, _LANE)

    grid = (rows_p // br,)
    spec = pl.BlockSpec((br, _LANE), lambda i: (i, 0))
    cparams = pltpu.CompilerParams(dimension_semantics=("parallel",))
    out_shape = jax.ShapeDtypeStruct((rows_p, _LANE), dtype)

    apply_dropout = bool(train) and p > 0.0
    if apply_dropout:
        # per-element random bits drawn in the wrapper -> distinct randomness
        # per tile for free (no per-tile reseeding concerns).
        bits = jax.random.bits(key, (rows_p, _LANE), dtype=jnp.uint32)
        thresh = int(round(p * (1 << 24)))
        kernel = functools.partial(
            _add_pe_dropout_kernel, inv_keep=1.0 / (1.0 - p), thresh=thresh)
        out2 = pl.pallas_call(
            kernel,
            out_shape=out_shape,
            grid=grid,
            in_specs=[spec, spec, spec],
            out_specs=spec,
            input_output_aliases={0: 0},      # alias x slab -> output slab
            compiler_params=cparams,
        )(x2, pe2, bits)
    else:
        out2 = pl.pallas_call(
            _add_pe_kernel,
            out_shape=out_shape,
            grid=grid,
            in_specs=[spec, spec],
            out_specs=spec,
            input_output_aliases={0: 0},
            compiler_params=cparams,
        )(x2, pe2)

    return out2.reshape(-1)[:N].reshape(S, B, D)


# ----------------------------------------------------------------------------
# Demo / self-check
# ----------------------------------------------------------------------------
if __name__ == "__main__":
    S, B, D = 8, 2, 33          # seq_len, batch, d_model (odd D — see note above)
    MAX_LEN = 300
    P = 0.1

    root = jax.random.PRNGKey(0)
    kx, kd = jax.random.split(root)
    x = jax.random.normal(kx, (S, B, D), dtype=jnp.float32)
    pe = make_pe(D, MAX_LEN)

    # eval-mode pass (dropout is identity) — verify against pure-JAX reference
    out_eval = positional_encoding_fwd(x, pe, kd, p=P, train=False)
    jax.block_until_ready(out_eval)
    ref = np.asarray(x) + np.asarray(pe[:S])
    np.testing.assert_allclose(np.asarray(out_eval), ref, rtol=1e-6, atol=1e-6)

    # train-mode pass (dropout mask from wrapper-supplied random bits)
    out_train = positional_encoding_fwd(x, pe, kd, p=P, train=True)
    jax.block_until_ready(out_train)
    ot = np.asarray(out_train)
    assert ot.shape == (S, B, D)
    dropped = ot == 0.0          # test artifact: ignores exact x+pe==0 ties
    np.testing.assert_allclose(
        ot[~dropped], (ref / (1.0 - P))[~dropped], rtol=1e-5, atol=1e-5)
    assert 0.0 <= dropped.mean() <= 0.5   # loose sanity check on drop rate

    print("KERNEL_OK")
</pallas_src>

<mosaic_0001>
module attributes {stable_mosaic.version = 11 : i64} {
  func.func @_add_pe_kernel(%arg0: i32, %arg1: memref<8x128xf32, #tpu.memory_space<vmem>>, %arg2: memref<8x128xf32, #tpu.memory_space<vmem>>, %arg3: memref<8x128xf32, #tpu.memory_space<vmem>>) attributes {dimension_semantics = [#tpu.dimension_semantics<parallel>], iteration_bounds = array<i64: 1>, scalar_prefetch = 0 : i64, scratch_operands = 0 : i64, tpu.core_type = #tpu.core_type<tc>, window_params = [{transform_indices = @transform_0, window_bounds = array<i64: 8, 128>}, {transform_indices = @transform_1, window_bounds = array<i64: 8, 128>}, {transform_indices = @transform_2, window_bounds = array<i64: 8, 128>}]} {
    %c0 = arith.constant 0 : index
    %c0_0 = arith.constant 0 : index
    %0 = vector.load %arg1[%c0, %c0_0] : memref<8x128xf32, #tpu.memory_space<vmem>>, vector<8x128xf32>
    %c0_1 = arith.constant 0 : index
    %c0_2 = arith.constant 0 : index
    %1 = vector.load %arg2[%c0_1, %c0_2] : memref<8x128xf32, #tpu.memory_space<vmem>>, vector<8x128xf32>
    %2 = arith.addf %0, %1 : vector<8x128xf32>
    %c0_3 = arith.constant 0 : index
    %c0_4 = arith.constant 0 : index
    %3 = vector.load %arg3[%c0_3, %c0_4] : memref<8x128xf32, #tpu.memory_space<vmem>>, vector<8x128xf32>
    tpu.vector_store %arg3[%c0_3, %c0_4], %2 {strides = array<i32>} : memref<8x128xf32, #tpu.memory_space<vmem>>, vector<8x128xf32>,
    return
  }
  func.func @transform_0(%arg0: i32) -> (i32, i32) {
    %c0_i32 = arith.constant 0 : i32
    %c0_i32_0 = arith.constant 0 : i32
    return %arg0, %c0_i32 : i32, i32
  }
  func.func @transform_1(%arg0: i32) -> (i32, i32) {
    %c0_i32 = arith.constant 0 : i32
    %c0_i32_0 = arith.constant 0 : i32
    return %arg0, %c0_i32 : i32, i32
  }
  func.func @transform_2(%arg0: i32) -> (i32, i32) {
    %c0_i32 = arith.constant 0 : i32
    %c0_i32_0 = arith.constant 0 : i32
    return %arg0, %c0_i32 : i32, i32
  }
}

</mosaic_0001>

<bundles_post_ra>
// kernel: positional_encoding_fwd.1
= control target key start
LH: loop header
LB: loop body
LE: loop exit
PB: predicated region body
PF: predicated region fallthrough
CT: control target
= control target key end

     0   :  { %s43_s0 = inlined_call_operand.vmem [shape: f32[8,128], index: 0, kind: input, shape index: {}, may-alias: {0,2}]   ;;  %s44_s1 = inlined_call_operand.vmem [shape: f32[8,128], index: 1, kind: input, shape index: {}]   ;;  %s45_s2 = inlined_call_operand.vmem [shape: f32[8,128], index: 2, kind: output, shape index: {}, may-alias: {0,2}]  }
   0x1   :  { %v11_v0 = vld [vmem:[%s43_s0] sm:$0xff] }
   0x2   :  { %v12_v1 = vld [vmem:[%s44_s1] sm:$0xff] }
   0x3   :  { %v13_v2 = vadd.f32 %v12_v1, %v11_v0 }
   0x5   :  { %14 = vst [vmem:[%s45_s2] sm:$0xff] %v13_v2 }

</bundles_post_ra>
